<compile_context>
chip_gen: v7x
topology: tpu7x:2x2x1
jax: 0.10.0
libtpu: 0.0.40
codegen_flags: <defaults>
</compile_context>

<pallas_src>
import functools

import jax
import jax.numpy as jnp
from jax.experimental import pallas as pl
from jax.experimental.pallas import tpu as pltpu

LANE = 128
SUBLANE = 8


def _chip_generation():
    """Best-effort TPU generation (4/5/6/7) from the device kind string."""
    try:
        kind = jax.devices()[0].device_kind.lower()
    except Exception:
        return None
    for gen in (7, 6, 5, 4):
        if (f"v{gen}" in kind) or (f"tpu{gen}" in kind):
            return gen
    return None


def _penalized_tanh_kernel(x_ref, o_ref, *, compute_dtype):
    x = x_ref[...].astype(compute_dtype)
    t = jnp.tanh(x)
    # max(t, 0.25*t) == where(x > 0, t, 0.25*t) since tanh is sign-preserving.
    o_ref[...] = jnp.maximum(t, 0.25 * t).astype(o_ref.dtype)


def _penalized_tanh_jnp(x, compute_dtype):
    """Plain-jnp path for tails / tiny tensors (still exact same math)."""
    t = jnp.tanh(x.astype(compute_dtype))
    return jnp.maximum(t, 0.25 * t).astype(x.dtype)


def _run_slab(slab, rows, itemsize, sublane_mult, compute_dtype,
              target_block_bytes, donate_input):
    """Run the kernel over a lane-dense [rows, 128] slab (rows % sublane_mult == 0)."""
    # Biggest block that hits the per-generation target.
    tile_rows = max(sublane_mult, target_block_bytes // (LANE * itemsize))
    tile_rows -= tile_rows % sublane_mult
    tile_rows = min(tile_rows, rows)
    # Guarantee >= 2 grid blocks when possible so v7x's second TensorCore gets
    # work ("parallel" grid axis shards across cores). Large tensors already
    # have many blocks, so this only affects small/medium inputs.
    if rows >= 2 * sublane_mult:
        half = (rows + 1) // 2
        half = -(-half // sublane_mult) * sublane_mult
        tile_rows = min(tile_rows, half)
    grid = (pl.cdiv(rows, tile_rows),)  # partial edge block is fine (masked)

    block_bytes = tile_rows * LANE * itemsize
    # (in + out) x double-buffering, plus headroom for DMA metadata.
    vmem_limit = min(block_bytes * 4 + (4 << 20), 32 << 20)

    n = rows * LANE
    cost = pl.CostEstimate(
        flops=3 * n,
        transcendentals=n,
        bytes_accessed=2 * n * itemsize,
    )

    kernel = functools.partial(_penalized_tanh_kernel, compute_dtype=compute_dtype)
    return pl.pallas_call(
        kernel,
        out_shape=jax.ShapeDtypeStruct((rows, LANE), slab.dtype),
        grid_spec=pltpu.PrefetchScalarGridSpec(
            num_scalar_prefetch=0,
            grid=grid,
            in_specs=[pl.BlockSpec((tile_rows, LANE), lambda i: (i, 0))],
            out_specs=pl.BlockSpec((tile_rows, LANE), lambda i: (i, 0)),
        ),
        compiler_params=pltpu.CompilerParams(
            dimension_semantics=("parallel",),
            vmem_limit_bytes=vmem_limit,
        ),
        cost_estimate=cost,
        input_output_aliases=({0: 0} if donate_input else {}),
    )(slab)


def penalized_tanh(x, donate_input=False):
    """Elementwise PenalizedTanH. Any shape / float dtype; NCHW expected.

    donate_input=True aliases the input slab to the output (PyTorch inplace
    analogue); only meaningful if the caller donates x at the jit boundary.
    """
    orig_shape = x.shape
    dtype = x.dtype
    itemsize = jnp.dtype(dtype).itemsize
    n = x.size
    if n == 0:
        return x

    gen = _chip_generation()
    if gen is not None and gen >= 6:
        target_block_bytes = 4 * 1024 * 1024      # bigger blocks: overhead ~5%
        native_low_precision = True               # v6e/v7x have bf16 VPU/EUP
    else:
        target_block_bytes = 2 * 1024 * 1024      # respect v5e 16 MiB scoped VMEM
        native_low_precision = False              # v5e: compute in f32

    if native_low_precision and (dtype == jnp.float32 or dtype == jnp.bfloat16):
        compute_dtype = dtype
    else:
        compute_dtype = jnp.float32

    # Sub-32-bit dtypes pack along sublanes: min second-to-last tile dim is
    # 8 (f32), 16 (bf16), 32 (int8/fp8).
    sublane_mult = max(SUBLANE, 32 // itemsize)
    align = sublane_mult * LANE

    flat = x.reshape(-1)
    aligned_n = (n // align) * align

    if aligned_n == n:
        # Fast path: whole tensor is lane/sublane aligned — zero extra copies.
        rows = n // LANE
        out = _run_slab(flat.reshape(rows, LANE), rows, itemsize, sublane_mult,
                        compute_dtype, target_block_bytes, donate_input)
        return out.reshape(orig_shape)

    if aligned_n == 0:
        # Tiny tensor (< one aligned tile): plain jnp beats any Pallas overhead.
        return _penalized_tanh_jnp(flat, compute_dtype).reshape(orig_shape)

    # Prefix + tail: kernel over the largest aligned prefix, <align-element
    # tail via plain jnp. Avoids the old pad + full-slice round trip (~3x HBM
    # traffic) while leaving the aligned fast path untouched.
    rows = aligned_n // LANE
    prefix = _run_slab(flat[:aligned_n].reshape(rows, LANE), rows, itemsize,
                       sublane_mult, compute_dtype, target_block_bytes, False)
    tail = _penalized_tanh_jnp(flat[aligned_n:], compute_dtype)
    return jnp.concatenate([prefix.reshape(-1), tail]).reshape(orig_shape)


def _reference(x):
    xf = x.astype(jnp.float32)
    t = jnp.tanh(xf)
    return jnp.where(xf > 0, t, 0.25 * t).astype(x.dtype)


if __name__ == "__main__":
    key = jax.random.PRNGKey(0)

    # 1) NCHW f32 input, aligned fast path: batch=2, channels=4, spatial=16x16.
    x = jax.random.normal(key, (2, 4, 16, 16), dtype=jnp.float32)
    out = jax.block_until_ready(penalized_tanh(x))
    assert out.shape == x.shape and out.dtype == x.dtype
    assert jnp.allclose(out, _reference(x), atol=1e-6, rtol=1e-6), "f32 mismatch"

    # 2) Unaligned shape exercising the prefix(kernel) + tail(jnp) path.
    x2 = jax.random.normal(jax.random.PRNGKey(1), (2, 3, 16, 17), dtype=jnp.float32)
    out2 = jax.block_until_ready(penalized_tanh(x2))
    assert jnp.allclose(out2, _reference(x2), atol=1e-6, rtol=1e-6), "prefix+tail mismatch"

    # 3) Tiny unaligned shape (pure-jnp fallback path).
    x3 = jax.random.normal(jax.random.PRNGKey(2), (3, 5, 7, 9), dtype=jnp.float32)
    out3 = jax.block_until_ready(penalized_tanh(x3))
    assert jnp.allclose(out3, _reference(x3), atol=1e-6, rtol=1e-6), "tiny-path mismatch"

    # 4) bf16 input (native bf16 compute on v6e/v7x, f32 path on v5e) — loose tol.
    x4 = jax.random.normal(jax.random.PRNGKey(3), (2, 4, 16, 16), dtype=jnp.bfloat16)
    out4 = jax.block_until_ready(penalized_tanh(x4))
    assert out4.dtype == jnp.bfloat16
    assert jnp.allclose(out4.astype(jnp.float32),
                        _reference(x4).astype(jnp.float32),
                        atol=2e-2, rtol=2e-2), "bf16 mismatch"

    print("KERNEL_OK")
</pallas_src>

<mosaic_0001>
module attributes {stable_mosaic.version = 11 : i64} {
  func.func @_penalized_tanh_kernel(%arg0: i32, %arg1: memref<8x128xf32, #tpu.memory_space<vmem>>, %arg2: memref<8x128xf32, #tpu.memory_space<vmem>>) attributes {dimension_semantics = [#tpu.dimension_semantics<parallel>], iteration_bounds = array<i64: 2>, scalar_prefetch = 0 : i64, scratch_operands = 0 : i64, tpu.core_type = #tpu.core_type<tc>, window_params = [{transform_indices = @transform_0, window_bounds = array<i64: 8, 128>}, {transform_indices = @transform_1, window_bounds = array<i64: 8, 128>}]} {
    %c0 = arith.constant 0 : index
    %c0_0 = arith.constant 0 : index
    %0 = vector.load %arg1[%c0, %c0_0] : memref<8x128xf32, #tpu.memory_space<vmem>>, vector<8x128xf32>
    %1 = math.tanh %0 : vector<8x128xf32>
    %cst = arith.constant 2.500000e-01 : f32
    %2 = vector.broadcast %cst : f32 to vector<8x128xf32>
    %3 = arith.mulf %2, %1 : vector<8x128xf32>
    %4 = arith.maximumf %1, %3 : vector<8x128xf32>
    %c0_1 = arith.constant 0 : index
    %c0_2 = arith.constant 0 : index
    %5 = vector.load %arg2[%c0_1, %c0_2] : memref<8x128xf32, #tpu.memory_space<vmem>>, vector<8x128xf32>
    tpu.vector_store %arg2[%c0_1, %c0_2], %4 {strides = array<i32>} : memref<8x128xf32, #tpu.memory_space<vmem>>, vector<8x128xf32>,
    return
  }
  func.func @transform_0(%arg0: i32) -> (i32, i32) {
    %c0_i32 = arith.constant 0 : i32
    %c0_i32_0 = arith.constant 0 : i32
    return %arg0, %c0_i32 : i32, i32
  }
  func.func @transform_1(%arg0: i32) -> (i32, i32) {
    %c0_i32 = arith.constant 0 : i32
    %c0_i32_0 = arith.constant 0 : i32
    return %arg0, %c0_i32 : i32, i32
  }
}

</mosaic_0001>

<bundles_post_ra>
// kernel: tpu_custom_call.1
= control target key start
LH: loop header
LB: loop body
LE: loop exit
PB: predicated region body
PF: predicated region fallthrough
CT: control target
= control target key end

     0   :  { %6 = vsyncpa [#allocation3], 0  ;;  %s552_s0 = inlined_call_operand.hbm [shape: f32[16,128], index: 0, kind: input, shape index: {}]   ;;  %s553_s1 = inlined_call_operand.hbm [shape: f32[16,128], index: 1, kind: output, shape index: {}]  }
   0x1   :  { %8 = vsyncpa [#allocation3 + $0x1], 0 }
   0x2   :  { %9 = vsyncpa [#allocation4], 0 }
   0x3   :  { %11 = vsyncpa [#allocation4 + $0x1], 0  ;;  %s391_s6 = smov 0   ;;  %s393_s7 = smov 0  }
   0x4   :  { %s395_s8 = smov 0   ;;  %s397_s9 = smov 0  }
   0x5 LB: > { %s412_s10 = sadd.s32 4294967295, %s377_s9   ;;  %s221_s11 = sadd.s32 4294967294, %s377_s9   ;;  %s377_s9 = sphi %s397_s9, %s568_s9   ;;  %s373_s8 = sphi %s395_s8, %s567_s8   ;;  %s369_s7 = sphi %s393_s7, %s566_s7   ;;  %s365_s6 = sphi %s391_s6, %s565_s6  }
   0x6   : > { %s416_s12 = sadd.s32 1, %s377_s9   ;;  %s24_s13 = sadd.s32 1, %s373_s8 }
   0x7   : > { %s21_s14 = ssub.s32 %s377_s9, %s416_s12  ;;  %p31_p0 = scmp.ne.s32.totalorder %s373_s8, %s369_s7 }
   0x8   : > { %p22_p1 = scmp.eq.s32.totalorder %s21_s14, 0  ;;  %p32_p2 = scmp.eq.s32.totalorder %s377_s9, 0 }
   0x9   : > { %p37_p3 = scmp.ne.s32.totalorder %s369_s7, %s365_s6  ;;  %p38_p4 = scmp.eq.s32.totalorder %s412_s10, 0 }
   0xa   : > { %s428_s15 = scalar_select %p22_p1, %s373_s8, %s24_s13  }
   0xb   : > { %p430_p5 = por %p32_p2, %p31_p0  ;;  %p434_p6 = por %p38_p4, %p37_p3 }
   0xc   : > { %p61_p7 = scmp.eq.s32.totalorder %s412_s10, 1  ;;  %p67_p8 = scmp.eq.s32.totalorder %s221_s11, 1 }
   0xd   : > { %p245_p10 = scmp.lt.s32.totalorder %s377_s9, 2  ;;  %s87_s20 = sand.u32 1, %s373_s8  }
   0xe   : > { %p441_p11 = por %p61_p7, %p31_p0  ;;  %p445_p12 = por %p67_p8, %p37_p3 }
   0xf   : > { %s225_s21 = sshll.u32 %s377_s9, 7  ;;  %s224_s22 = sshll.u32 %s87_s20, 3 }
  0x10   : > { %s557_s18 = scalar_select %p441_p11, 1, 0 }
  0x11   : > { %s558_s19 = scalar_select %p445_p12, 1, 0 }
  0x12   : > { %s454_s25 = scalar_lea.hbm %s552_s0, %s225_s21  ;;  %s91_s26 = scalar_lea.vmem [#allocation2], %s224_s22 }
  0x13   : > { %s98_s27 = sshll.u32 %s91_s26, 4  ;;  %p458_p13 = pnand %p245_p10, %p430_p5  ;;  %s462_s27 = int_to_ptr.vmem [resolvable:$true] %s98_s27 }
  0x14   : > { %s88_s29 = scalar_lea.sflag [#allocation3], %s87_s20  ;;  %s281_s30 = scalar_lea.hbm %s454_s25, 128 }
  0x15   : > { %p282_p2 = scmp.ne.s32.totalorder %s454_s25, %s281_s30  ;;  %p283_p3 = pneg %p458_p13 }
  0x16   : > { %s286_s4 = scalar_lea.hbm %s552_s0, 256  ;;  %p287_p5 = scmp.lt.u32.totalorder %s454_s25, %s552_s0 }
  0x17   : > { %p284_p4 = pnand %p283_p3, %p282_p2  ;;  %p288_p8 = scmp.lt.u32.totalorder %s286_s4, %s281_s30 }
  0x18   : > { %p290_p9 = scmp.lt.u32.totalorder %s281_s30, %s454_s25 }
  0x19   : > { %p285_p7 = pneg %p284_p4  ;;  %p289_p10 = por %p288_p8, %p287_p5 }
  0x1b   : > { %p291_p0 = por %p290_p9, %p289_p10 }
  0x1d   : > { %p292_p1 = pnand %p291_p0, %p285_p7 }
  0x1f   : > { %295 = shalt.err (!%p292_p1)
}
  0x20   : > { %s296_s13 = scalar_lea.vmem %s462_s27, 128  ;;  %s379_s14 = smov [#allocation2]  }
  0x21   : > { %p297_p2 = scmp.ne.s32.totalorder %s462_s27, %s296_s13  ;;  %s301_s16 = sshll.u32 %s379_s14, 4  ;;  %s302_s16 = int_to_ptr.vmem [resolvable:$false] %s301_s16 }
  0x22   : > { %s303_s20 = scalar_lea.vmem %s302_s16, 256  ;;  %p304_p11 = scmp.lt.s32.totalorder %s462_s27, %s302_s16 }
  0x23   : > { %p299_p4 = pnand %p297_p2, %p283_p3  ;;  %p305_p5 = scmp.lt.s32.totalorder %s303_s20, %s296_s13 }
  0x25   : > { %p300_p12 = pneg %p299_p4  ;;  %p306_p8 = por %p305_p5, %p304_p11 }
  0x27   : > { %p307_p9 = pnand %p306_p8, %p300_p12 }
  0x29   : > { %310 = shalt.err (!%p307_p9)
}
  0x2a   : > { %240 = dma.hbm_to_vmem [thread:$0]  (!%p458_p13), %s454_s25, 128, %s462_s27, %s88_s29  }
  0x2b   : > { %p560_p0 = scmp.lt.s32.totalorder %s377_s9, 3  ;;  %p561_p1 = scmp.ge.s32.totalorder %s377_s9, 1 }
  0x2d   : > { %p104_p3 = pnand %p561_p1, %p560_p0 }
  0x2e   : > { %s496_s21 = sand.u32 (!%p104_p3), 1, %s369_s7  }
  0x2f   : > { %107 = sbr.rel (%p104_p3) target bundleno = 85 (0x55), region = 24  ;;  %s227_s22 = sshll.u32 (!%p104_p3), %s496_s21, 3 }
  0x30   : > { %s110_s23 = scalar_lea.sflag (!%p104_p3), [#allocation3], %s496_s21  ;;  %s113_s24 = scalar_lea.vmem (!%p104_p3), [#allocation2], %s227_s22 }
  0x36   : > { %356 = dma.done.wait (%p434_p6), %s110_s23, 128  }
  0x37   : > { %358 = vsyncadd (%p434_p6), %s110_s23, 4294967168  ;;  %v132_v0 = vld [vmem:[%s113_s24] sm:$0xff]  ;;  %s131_s25 = scalar_lea.vmem [#allocation5], %s227_s22  ;;  %s230_s27 = sshll.u32 %s412_s10, 7 }
  0x38   : > { %279 = vtanh.f32 %v132_v0  ;;  %s151_s26 = sshll.u32 %s131_s25, 4  ;;  %s510_s17 = scalar_lea.hbm %s553_s1, %s230_s27  ;;  %s505_s26 = int_to_ptr.vmem [resolvable:$true] %s151_s26 }
  0x39   : > { %s138_s30 = scalar_lea.sflag [#allocation4], %s496_s21  ;;  %s311_s2 = scalar_lea.vmem %s505_s26, 128 }
  0x3a   : > { %p312_p6 = scmp.ne.s32.totalorder %s505_s26, %s311_s2  ;;  %p562_p11 = scmp.ne.s32.totalorder %s557_s18, 0 }
  0x3b   : > { %s380_s10 = smov [#allocation5]  }
  0x3c   : > { %p313_p12 = pnand %p312_p6, %p562_p11  ;;  %s315_s3 = sshll.u32 %s380_s10, 4  ;;  %s316_s3 = int_to_ptr.vmem [resolvable:$false] %s315_s3 }
  0x3d   : > { %s317_s4 = scalar_lea.vmem %s316_s3, 256  ;;  %p318_p7 = scmp.lt.s32.totalorder %s505_s26, %s316_s3 }
  0x3e   : > { %p314_p13 = pneg %p313_p12  ;;  %p319_p10 = scmp.lt.s32.totalorder %s317_s4, %s311_s2 }
  0x40   : > { %p320_p2 = por %p319_p10, %p318_p7 }
  0x42   : > { %v280_v1 = vpop.eup %279  ;;  %p321_p4 = pnand %p320_p2, %p314_p13 }
  0x43   : > { %v134_v2 = vmul.f32 0.25, %v280_v1 }
  0x45   : > { %v135_v3 = vmax.f32 %v280_v1, %v134_v2 }
  0x47   : > { %136 = vst [vmem:[%s131_s25] sm:$0xff] %v135_v3 }
  0x48   : > { %324 = shalt.err (!%p321_p4)
}
  0x49   : > { %s325_s5 = scalar_lea.hbm %s510_s17, 128  ;;  %s329_s14 = scalar_lea.hbm %s553_s1, 256 }
  0x4a   : > { %p326_p5 = scmp.ne.s32.totalorder %s510_s17, %s325_s5  ;;  %p330_p0 = scmp.lt.u32.totalorder %s510_s17, %s553_s1 }
  0x4b   : > { %p331_p1 = scmp.lt.u32.totalorder %s329_s14, %s325_s5  ;;  %p333_p6 = scmp.lt.u32.totalorder %s325_s5, %s510_s17 }
  0x4c   : > { %p327_p8 = pnand %p326_p5, %p562_p11 }
  0x4d   : > { %p332_p3 = por %p331_p1, %p330_p0 }
  0x4e   : > { %p328_p9 = pneg %p327_p8 }
  0x4f   : > { %p334_p12 = por %p333_p6, %p332_p3 }
  0x51   : > { %p335_p13 = pnand %p334_p12, %p328_p9 }
  0x53   : > { %338 = shalt.err (!%p335_p13)
}
  0x54   : > { %235 = dma.vmem_to_hbm [thread:$0]  (%p562_p11), %s505_s26, 128, %s510_s17, %s138_s30  }
  0x55 PF: > { %s163_s21 = sand.u32 1, %s365_s6   ;;  %p563_p7 = scmp.ne.s32.totalorder %s558_s19, 0 }
  0x56   : > { %p564_p10 = scmp.ge.s32.totalorder %s377_s9, 2  ;;  %s164_s22 = scalar_lea.sflag [#allocation4], %s163_s21 }
  0x58   : > { %p242_p2 = pnand %p564_p10, %p563_p7 }
  0x5a   : > { %360 = dma.done.wait (!%p242_p2), %s164_s22, 128  }
  0x5b   : > { %362 = vsyncadd (!%p242_p2), %s164_s22, 4294967168  ;;  %p14_p4 = scmp.ge.s32.totalorder %s416_s12, 4   ;;  %s565_s6 = smov %s369_s7 }
  0x5c   : > { %s566_s7 = smov %s373_s8  ;;  %s567_s8 = smov %s428_s15 }
  0x5d   : > { %s568_s9 = smov %s416_s12  ;;  %16 = sbr.rel (!%p14_p4) target bundleno = 5 (0x5), region = 69 }
  0x64   :  { %169 = vsyncpa [#allocation3], 1 }
  0x65   :  { %171 = vsyncpa [#allocation3 + $0x1], 1 }
  0x66   :  { %172 = vsyncpa [#allocation4], 1 }
  0x67   :  { %174 = vsyncpa [#allocation4 + $0x1], 1 }

</bundles_post_ra>
